<compile_context>
chip_gen: v5e
topology: v5e:2x2
jax: 0.10.0
libtpu: 0.0.40
codegen_flags: <defaults>
</compile_context>

<pallas_src>
import functools

import jax
import jax.numpy as jnp
from jax.experimental import pallas as pl
from jax.experimental.pallas import tpu as pltpu


def _device_tuning():
    """Generation-aware tile size / scoped-VMEM limit / v5 detection.

    Falls back to conservative values (safe on every generation) if the
    hardware query is unavailable.
    """
    vmem_bytes = 64 << 20  # conservative fallback: assume smallest (v7x) VMEM
    is_v5 = False
    try:
        info = pltpu.get_tpu_info()
        vmem_bytes = int(getattr(info, "vmem_capacity_bytes", vmem_bytes))
        ver = getattr(info, "chip_version", None)
        is_v5 = ver is not None and "5" in str(ver)
    except Exception:
        pass

    if vmem_bytes <= (64 << 20):
        # v7x: 64 MiB VMEM per TensorCore.  >=512-row (~2 MiB) tiles already
        # hit ~85% of HBM roofline, so smaller tiles cost nothing and restore
        # VMEM headroom for double-buffering + f32 temporaries.
        target_tile_bytes = 2 << 20
        vmem_limit_bytes = 36 << 20
    else:
        # v5e / v6e: 128 MiB physical VMEM; 4 MiB tiles under a 48 MiB scoped
        # limit (bumps the 16/32 MiB defaults) pipeline cleanly.
        target_tile_bytes = 4 << 20
        vmem_limit_bytes = 48 << 20
    return target_tile_bytes, vmem_limit_bytes, is_v5


def _layernorm_kernel(x_ref, g_ref, b_ref, o_ref, *, eps, hidden, affine_bf16):
    # x_ref: (tr, hidden) block; g_ref/b_ref: (1, hidden); o_ref: (tr, hidden)
    #
    # Two-pass statistics (same numerics as the torch/JAX reference; immune to
    # the one-pass sumsq - N*mean^2 cancellation on offset inputs).  The input
    # block is re-read & re-cast from VMEM for each pass so no full-tile f32
    # temporary has to stay live across the reductions.
    inv_n = 1.0 / hidden
    inv_nm1 = 1.0 / (hidden - 1)

    mean = jnp.sum(x_ref[...].astype(jnp.float32), axis=-1, keepdims=True) * inv_n

    centered = x_ref[...].astype(jnp.float32) - mean
    # torch.std default is unbiased (divide by N-1).
    var = jnp.sum(centered * centered, axis=-1, keepdims=True) * inv_nm1

    # PyTorch module adds eps to std (not to var).  Narrow (tr, 1) reciprocal,
    # exact (approx=True may exceed the 1e-5 tolerance).
    inv_std = pl.reciprocal(jnp.sqrt(var) + eps, approx=False)

    # Normalize from a fresh read of the VMEM-resident block (cheap VPU cast,
    # zero extra HBM traffic).
    y = (x_ref[...].astype(jnp.float32) - mean) * inv_std

    if affine_bf16:
        # bf16 VALU packs 2x elements per vreg op (v6e/v7x): do the final
        # affine and the store-cast in bf16; statistics above stayed in f32.
        o_ref[...] = (
            y.astype(jnp.bfloat16) * g_ref[...].astype(jnp.bfloat16)
            + b_ref[...].astype(jnp.bfloat16)
        ).astype(o_ref.dtype)
    else:
        g = g_ref[...].astype(jnp.float32)
        b = b_ref[...].astype(jnp.float32)
        o_ref[...] = (y * g + b).astype(o_ref.dtype)


def layer_norm(x, g, b, eps=1e-05):
    """x: (..., hidden); g, b: (hidden,).  Matches the PyTorch module exactly."""
    orig_shape = x.shape
    hidden = orig_shape[-1]
    # torch.std(unbiased=True) divides by N-1; hidden == 1 is a silent NaN.
    assert hidden > 1, "LayerNorm over a single element is undefined (N-1 == 0)"

    rows = 1
    for d in orig_shape[:-1]:
        rows *= d
    x2 = x.reshape(rows, hidden)
    g2 = g.reshape(1, hidden)
    b2 = b.reshape(1, hidden)

    target_tile_bytes, vmem_limit_bytes, is_v5 = _device_tuning()
    affine_bf16 = (x.dtype == jnp.bfloat16) and (not is_v5)

    # Row tile: ~target_tile_bytes of x per block, rounded to the sublane pack
    # (8 rows f32, 16 bf16, 32 int8/fp8); clamp to the full row extent for
    # tiny inputs (full-extent blocks are always legal).
    itemsize = jnp.dtype(x.dtype).itemsize
    pack = max(8, 32 // itemsize)
    tr_big = max(pack, (target_tile_bytes // (hidden * itemsize)) // pack * pack)
    tr = int(min(tr_big, rows))
    if rows > pack:
        # Guarantee >= 2 grid blocks so the "parallel" axis can shard across
        # both v7x TensorCores (single-block inputs would leave one TC idle).
        half = max(pack, ((rows + 1) // 2) // pack * pack)
        tr = min(tr, half)

    num_blocks = pl.cdiv(rows, tr)

    kernel = functools.partial(
        _layernorm_kernel, eps=eps, hidden=hidden, affine_bf16=affine_bf16
    )

    out = pl.pallas_call(
        kernel,
        out_shape=jax.ShapeDtypeStruct((rows, hidden), x.dtype),
        grid_spec=pltpu.PrefetchScalarGridSpec(
            num_scalar_prefetch=0,
            grid=(num_blocks,),
            in_specs=[
                pl.BlockSpec((tr, hidden), lambda i: (i, 0)),
                pl.BlockSpec((1, hidden), lambda i: (0, 0)),
                pl.BlockSpec((1, hidden), lambda i: (0, 0)),
            ],
            out_specs=pl.BlockSpec((tr, hidden), lambda i: (i, 0)),
        ),
        compiler_params=pltpu.CompilerParams(
            dimension_semantics=("parallel",),
            vmem_limit_bytes=vmem_limit_bytes,
        ),
    )(x2, g2, b2)
    return out.reshape(orig_shape)


def layer_norm_ref(x, g, b, eps=1e-05):
    # pure-JAX reference matching the PyTorch module exactly
    x32 = x.astype(jnp.float32)
    mean = jnp.mean(x32, axis=-1, keepdims=True)
    n = x.shape[-1]
    var = jnp.sum((x32 - mean) ** 2, axis=-1, keepdims=True) / (n - 1)
    std = jnp.sqrt(var)
    y = (x32 - mean) / (std + eps)
    return (g.astype(jnp.float32) * y + b.astype(jnp.float32)).astype(x.dtype)


if __name__ == "__main__":
    batch, seq, hidden = 2, 8, 32
    key = jax.random.PRNGKey(0)
    k1, k2, k3, k4 = jax.random.split(key, 4)

    # deterministic parameters matching nn.Parameter(torch.ones / torch.zeros)
    g = jnp.ones((hidden,), dtype=jnp.float32)
    b = jnp.zeros((hidden,), dtype=jnp.float32)

    # 1) basic f32 case (rows = 16 -> two 8-row blocks, exercises multi-block
    #    "parallel" path).
    x = jax.random.normal(k1, (batch, seq, hidden), dtype=jnp.float32)
    out = jax.block_until_ready(layer_norm(x, g, b, eps=1e-05))
    ref = layer_norm_ref(x, g, b, eps=1e-05)
    assert out.shape == x.shape
    assert jnp.allclose(out, ref, atol=1e-5, rtol=1e-5), "mismatch vs reference"

    # 2) non-divisible row count (rows = 15 with 8-row tiles -> masked edge
    #    block writeback).
    x_edge = jax.random.normal(k2, (3, 5, hidden), dtype=jnp.float32)
    out_edge = jax.block_until_ready(layer_norm(x_edge, g, b, eps=1e-05))
    ref_edge = layer_norm_ref(x_edge, g, b, eps=1e-05)
    assert jnp.allclose(out_edge, ref_edge, atol=1e-5, rtol=1e-5), "edge-block mismatch"

    # 3) offset input (would expose one-pass variance cancellation); loose
    #    tolerance only accounts for f32 reduction-order differences at mean~100.
    x_off = jax.random.normal(k3, (batch, seq, hidden), dtype=jnp.float32) + 100.0
    out_off = jax.block_until_ready(layer_norm(x_off, g, b, eps=1e-05))
    ref_off = layer_norm_ref(x_off, g, b, eps=1e-05)
    assert jnp.allclose(out_off, ref_off, atol=1e-2, rtol=1e-2), "offset-input mismatch"

    # 4) bf16 I/O path (exercises the bf16 epilogue on v6e/v7x, f32 epilogue
    #    on v5e); tolerance sized for bf16 rounding of O(1) normalized outputs.
    x_b = jax.random.normal(k4, (batch, seq, hidden), dtype=jnp.bfloat16)
    out_b = jax.block_until_ready(
        layer_norm(x_b, g.astype(jnp.bfloat16), b.astype(jnp.bfloat16), eps=1e-05)
    )
    ref_b = layer_norm_ref(x_b, g.astype(jnp.bfloat16), b.astype(jnp.bfloat16), eps=1e-05)
    assert jnp.allclose(
        out_b.astype(jnp.float32), ref_b.astype(jnp.float32), atol=5e-2, rtol=5e-2
    ), "bf16 mismatch"

    print("KERNEL_OK")
</pallas_src>

<mosaic_0001>
module attributes {stable_mosaic.version = 11 : i64} {
  func.func @_layernorm_kernel(%arg0: i32, %arg1: memref<8x32xf32, #tpu.memory_space<vmem>>, %arg2: memref<1x32xf32, #tpu.memory_space<vmem>>, %arg3: memref<1x32xf32, #tpu.memory_space<vmem>>, %arg4: memref<8x32xf32, #tpu.memory_space<vmem>>) attributes {dimension_semantics = [#tpu.dimension_semantics<parallel>], iteration_bounds = array<i64: 2>, scalar_prefetch = 0 : i64, scratch_operands = 0 : i64, tpu.core_type = #tpu.core_type<tc>, window_params = [{transform_indices = @transform_0, window_bounds = array<i64: 8, 32>}, {pipeline_mode = #tpu.pipeline_mode<synchronous>, transform_indices = @transform_1, window_bounds = array<i64: 1, 32>}, {pipeline_mode = #tpu.pipeline_mode<synchronous>, transform_indices = @transform_2, window_bounds = array<i64: 1, 32>}, {transform_indices = @transform_3, window_bounds = array<i64: 8, 32>}]} {
    %c0 = arith.constant 0 : index
    %c0_0 = arith.constant 0 : index
    %0 = vector.load %arg1[%c0, %c0_0] : memref<8x32xf32, #tpu.memory_space<vmem>>, vector<8x32xf32>
    %cst = arith.constant dense<0.000000e+00> : vector<8xf32>
    %1 = vector.multi_reduction <add>, %0, %cst [1] : vector<8x32xf32> to vector<8xf32>
    %2 = vector.shape_cast %1 : vector<8xf32> to vector<8x1xf32>
    %cst_1 = arith.constant 3.125000e-02 : f32
    %3 = vector.broadcast %cst_1 : f32 to vector<8x1xf32>
    %4 = arith.mulf %2, %3 : vector<8x1xf32>
    %c0_2 = arith.constant 0 : index
    %c0_3 = arith.constant 0 : index
    %5 = vector.load %arg1[%c0_2, %c0_3] : memref<8x32xf32, #tpu.memory_space<vmem>>, vector<8x32xf32>
    %6 = vector.broadcast %4 : vector<8x1xf32> to vector<8x32xf32>
    %7 = arith.subf %5, %6 : vector<8x32xf32>
    %8 = arith.mulf %7, %7 : vector<8x32xf32>
    %cst_4 = arith.constant dense<0.000000e+00> : vector<8xf32>
    %9 = vector.multi_reduction <add>, %8, %cst_4 [1] : vector<8x32xf32> to vector<8xf32>
    %10 = vector.shape_cast %9 : vector<8xf32> to vector<8x1xf32>
    %cst_5 = arith.constant 0.0322580636 : f32
    %11 = vector.broadcast %cst_5 : f32 to vector<8x1xf32>
    %12 = arith.mulf %10, %11 : vector<8x1xf32>
    %13 = math.sqrt %12 : vector<8x1xf32>
    %cst_6 = arith.constant 9.99999974E-6 : f32
    %14 = vector.broadcast %cst_6 : f32 to vector<8x1xf32>
    %15 = arith.addf %13, %14 : vector<8x1xf32>
    %16 = tpu.reciprocal %15 : vector<8x1xf32> -> vector<8x1xf32>
    %c0_7 = arith.constant 0 : index
    %c0_8 = arith.constant 0 : index
    %17 = vector.load %arg1[%c0_7, %c0_8] : memref<8x32xf32, #tpu.memory_space<vmem>>, vector<8x32xf32>
    %18 = vector.broadcast %4 : vector<8x1xf32> to vector<8x32xf32>
    %19 = arith.subf %17, %18 : vector<8x32xf32>
    %20 = vector.broadcast %16 : vector<8x1xf32> to vector<8x32xf32>
    %21 = arith.mulf %19, %20 : vector<8x32xf32>
    %c0_9 = arith.constant 0 : index
    %c0_10 = arith.constant 0 : index
    %22 = vector.load %arg2[%c0_9, %c0_10] : memref<1x32xf32, #tpu.memory_space<vmem>>, vector<1x32xf32>
    %c0_11 = arith.constant 0 : index
    %c0_12 = arith.constant 0 : index
    %23 = vector.load %arg3[%c0_11, %c0_12] : memref<1x32xf32, #tpu.memory_space<vmem>>, vector<1x32xf32>
    %24 = vector.broadcast %22 : vector<1x32xf32> to vector<8x32xf32>
    %25 = arith.mulf %21, %24 : vector<8x32xf32>
    %26 = vector.broadcast %23 : vector<1x32xf32> to vector<8x32xf32>
    %27 = arith.addf %25, %26 : vector<8x32xf32>
    %c0_13 = arith.constant 0 : index
    %c0_14 = arith.constant 0 : index
    %28 = vector.load %arg4[%c0_13, %c0_14] : memref<8x32xf32, #tpu.memory_space<vmem>>, vector<8x32xf32>
    tpu.vector_store %arg4[%c0_13, %c0_14], %27 {strides = array<i32>} : memref<8x32xf32, #tpu.memory_space<vmem>>, vector<8x32xf32>,
    return
  }
  func.func @transform_0(%arg0: i32) -> (i32, i32) {
    %c0_i32 = arith.constant 0 : i32
    %c0_i32_0 = arith.constant 0 : i32
    return %arg0, %c0_i32 : i32, i32
  }
  func.func @transform_1(%arg0: i32) -> (i32, i32) {
    %c0_i32 = arith.constant 0 : i32
    %c0_i32_0 = arith.constant 0 : i32
    %c0_i32_1 = arith.constant 0 : i32
    return %c0_i32, %c0_i32_0 : i32, i32
  }
  func.func @transform_2(%arg0: i32) -> (i32, i32) {
    %c0_i32 = arith.constant 0 : i32
    %c0_i32_0 = arith.constant 0 : i32
    %c0_i32_1 = arith.constant 0 : i32
    return %c0_i32, %c0_i32_0 : i32, i32
  }
  func.func @transform_3(%arg0: i32) -> (i32, i32) {
    %c0_i32 = arith.constant 0 : i32
    %c0_i32_0 = arith.constant 0 : i32
    return %arg0, %c0_i32 : i32, i32
  }
}

</mosaic_0001>

<bundles_post_ra>
// kernel: tpu_custom_call.1
= control target key start
LH: loop header
LB: loop body
LE: loop exit
PB: predicated region body
PF: predicated region fallthrough
CT: control target
= control target key end

     0   :  { %8 = vsyncpa [#allocation3], 0  ;;  %s728_s0 = inlined_call_operand.hbm [shape: f32[16,32], index: 0, kind: input, shape index: {}]   ;;  %s729_s1 = inlined_call_operand.hbm [shape: f32[1,32], index: 1, kind: input, shape index: {}]   ;;  %s730_s2 = inlined_call_operand.vmem [shape: f32[1,32], index: 2, kind: input, shape index: {}]   ;;  %s731_s3 = inlined_call_operand.hbm [shape: f32[16,32], index: 3, kind: output, shape index: {}]  }
   0x1   :  { %10 = vsyncpa [#allocation3 + $0x1], 0 }
   0x2   :  { %11 = vsyncpa [#allocation6], 0 }
   0x3   :  { %12 = vsyncpa [#allocation4], 0 }
   0x4   :  { %14 = vsyncpa [#allocation4 + $0x1], 0  ;;  %s580_s12 = smov 0   ;;  %s582_s13 = smov 0  }
   0x5   :  { %s584_s14 = smov 0   ;;  %s586_s15 = smov 0  }
   0x6 LB: > { %s601_s16 = sadd.s32 4294967295, %s557_s15   ;;  %s350_s17 = sadd.s32 4294967294, %s557_s15   ;;  %s557_s15 = sphi %s586_s15, %s741_s15   ;;  %s553_s14 = sphi %s584_s14, %s740_s14   ;;  %s549_s13 = sphi %s582_s13, %s739_s13   ;;  %s545_s12 = sphi %s580_s12, %s738_s12  }
   0x7   : > { %p40_p0 = scmp.ne.s32.totalorder %s549_s13, %s545_s12  ;;  %p41_p1 = scmp.eq.s32.totalorder %s601_s16, 0 }
   0x8   : > { %p106_p2 = scmp.eq.s32.totalorder %s601_s16, 1  ;;  %p112_p3 = scmp.eq.s32.totalorder %s350_s17, 1 }
   0x9   : > { %p610_p4 = por %p41_p1, %p40_p0  ;;  %p351_p5 = scmp.ge.s32.totalorder %s557_s15, 1 }
   0xa   : > { %p615_p6 = por %p112_p3, %p40_p0  ;;  %p119_p7 = scmp.lt.s32.totalorder %s557_s15, 3 }
   0xb   : > { %s131_s22 = sshll.u32 %s729_s1, 4  ;;  %s559_s24 = smov [#allocation5]   ;;  %s132_s22 = int_to_ptr.hbm [resolvable:$true] %s131_s22 }
   0xc   : > { %p623_p8 = pnand %p351_p5, %p119_p7  ;;  %s133_s25 = sshll.u32 %s559_s24, 4  ;;  %s134_s25 = int_to_ptr.vmem [resolvable:$true] %s133_s25 }
   0xd   : > { %s633_s26 = sadd.s32 1, %s557_s15   ;;  %s27_s27 = sadd.s32 1, %s553_s14 }
   0xe   : > { %p372_p10 = pneg %p623_p8  ;;  %s24_s28 = ssub.s32 %s557_s15, %s633_s26 }
   0xf   : > { %p25_p12 = scmp.eq.s32.totalorder %s24_s28, 0  ;;  %p34_p13 = scmp.ne.s32.totalorder %s553_s14, %s549_s13 }
  0x10   : > { %p373_p11 = pnand %p372_p10, %p41_p1  ;;  %p35_p0 = scmp.eq.s32.totalorder %s557_s15, 0 }
  0x11   : > { %s642_s29 = scalar_select %p25_p12, %s553_s14, %s27_s27  }
  0x12   : > { %375 = dma.hbm_to_vmem [thread:$0]  (!%p373_p11), %s132_s22, 16, %s134_s25, [#allocation6]  }
  0x13   : > { %p646_p3 = por %p106_p2, %p34_p13  ;;  %p385_p5 = scmp.lt.s32.totalorder %s557_s15, 2 }
  0x14   : > { %s147_s4 = sand.u32 1, %s553_s14   ;;  %s355_s5 = sshll.u32 %s557_s15, 3 }
  0x15   : > { %p36_p7 = por %p35_p0, %p34_p13  ;;  %s354_s6 = sshll.u32 %s147_s4, 3 }
  0x16   : > { %s155_s9 = scalar_lea.hbm %s728_s0, %s355_s5  ;;  %s151_s11 = scalar_lea.vmem [#allocation2], %s354_s6 }
  0x17   : > { %s157_s10 = sshll.u32 %s155_s9, 4  ;;  %s159_s17 = sshll.u32 %s151_s11, 4  ;;  %s158_s10 = int_to_ptr.hbm [resolvable:$true] %s157_s10  ;;  %s160_s17 = int_to_ptr.vmem [resolvable:$true] %s159_s17 }
  0x18   : > { %p656_p10 = pnand %p385_p5, %p36_p7  ;;  %s148_s21 = scalar_lea.sflag [#allocation3], %s147_s4 }
  0x19   : > { %s457_s22 = sshra.s32 %s158_s10, 4  ;;  %s464_s28 = scalar_lea.hbm %s728_s0, 16  ;;  %s458_s22 = int_to_ptr.hbm [resolvable:$true] %s457_s22 }
  0x1a   : > { %s459_s24 = scalar_lea.hbm %s458_s22, 8  ;;  %p461_p11 = pneg %p656_p10 }
  0x1b   : > { %p460_p2 = scmp.ne.s32.totalorder %s458_s22, %s459_s24  ;;  %p465_p0 = scmp.lt.s32.totalorder %s458_s22, %s728_s0 }
  0x1c   : > { %p466_p5 = scmp.lt.s32.totalorder %s464_s28, %s459_s24 }
  0x1d   : > { %p462_p12 = pnand %p461_p11, %p460_p2 }
  0x1e   : > { %p467_p7 = por %p466_p5, %p465_p0 }
  0x1f   : > { %p463_p13 = pneg %p462_p12 }
  0x21   : > { %p468_p9 = pnand %p467_p7, %p463_p13 }
  0x23   : > { %471 = shalt.err (!%p468_p9)
}
  0x24   : > { %379 = dma.hbm_to_vmem [thread:$0]  (!%p656_p10), %s158_s10, 128, %s160_s17, %s148_s21  }
  0x25   : > { %168 = sbr.rel (%p623_p8) target bundleno = 337 (0x151), region = 32  ;;  %s673_s4 = sand.u32 (!%p623_p8), 1, %s549_s13  }
  0x26   : > { %s357_s7 = sshll.u32 (!%p623_p8), %s673_s4, 3  ;;  %s171_s8 = scalar_lea.sflag (!%p623_p8), [#allocation3], %s673_s4 }
  0x27   : > { %s174_s9 = scalar_lea.vmem (!%p623_p8), [#allocation2], %s357_s7 }
  0x2a   : > { %532 = dma.done.wait (%p610_p4), %s171_s8, 128  }
  0x2b   : > { %534 = vsyncadd (%p610_p4), %s171_s8, 4294967168 }
  0x2c   : > { %536 = dma.done.wait (%p41_p1), [#allocation6], 16  }
  0x2d   : > { %538 = vsyncadd (%p41_p1), [#allocation6], 4294967280  ;;  %vm204_vm0 = vcmask 261120   ;;  %v203_v0 = vld [vmem:[%s174_s9] sm:$0xff]  ;;  %s361_s18 = sshll.u32 %s601_s16, 3  ;;  %s202_s16 = scalar_lea.vmem [#allocation7], %s357_s7 }
  0x2e   : > { %v205_v1 = vsel %vm204_vm0, %v203_v0, 0.0  ;;  %v421_v29 = vld [vmem:[#allocation5] ss:$0 sm:$0xff]  ;;  %s265_s11 = scalar_lea.hbm %s731_s3, %s361_s18  ;;  %v422_v32 = vld [vmem:[%s730_s2] ss:$0 sm:$0xff]  ;;  %s267_s21 = sshll.u32 %s202_s16, 4  ;;  %s268_s21 = int_to_ptr.vmem [resolvable:$true] %s267_s21 }
  0x2f   : > { %206 = vadd.xlane.f32.xlu0 %v205_v1  ;;  %s269_s22 = sshll.u32 %s265_s11, 4  ;;  %s255_s24 = scalar_lea.sflag [#allocation4], %s673_s4  ;;  %s270_s22 = int_to_ptr.hbm [resolvable:$true] %s269_s22 }
  0x30   : > { %s501_s25 = sshra.s32 %s270_s22, 4  ;;  %s507_s6 = scalar_lea.hbm %s731_s3, 16  ;;  %s502_s25 = int_to_ptr.hbm [resolvable:$true] %s501_s25 }
  0x31   : > { %s503_s27 = scalar_lea.hbm %s502_s25, 8  ;;  %p508_p9 = scmp.lt.s32.totalorder %s502_s25, %s731_s3 }
  0x32   : > { %p504_p1 = scmp.ne.s32.totalorder %s502_s25, %s503_s27  ;;  %p509_p10 = scmp.lt.s32.totalorder %s507_s6, %s503_s27 }
  0x34   : > { %p505_p4 = pnand %p504_p1, %p646_p3  ;;  %p510_p2 = por %p509_p10, %p508_p9 }
  0x36   : > { %p506_p8 = pneg %p505_p4 }
  0x38   : > { %p511_p11 = pnand %p510_p2, %p506_p8 }
  0xa2   : > { %v207_v2 = vpop.xlane.xlu0 %206 }
  0xa3   : > { %v208_v3 = vmul.f32 0.03125, %v207_v2 }
  0xa5   : > { %v209_v4 = vsub.f32 %v203_v0, %v208_v3 }
  0xa7   : > { %v210_v5 = vmul.f32 %v209_v4, %v209_v4 }
  0xa9   : > { %v211_v6 = vsel %vm204_vm0, %v210_v5, 0.0 }
  0xaa   : > { %212 = vadd.xlane.f32.xlu0 %v211_v6 }
 0x11d   : > { %v213_v7 = vpop.xlane.xlu0 %212 }
 0x11e   : > { %v214_v8 = vmul.f32 0.032258064, %v213_v7 }
 0x120   : > { %423 = vrsqrt.f32 %v214_v8  ;;  %vm222_vm1 = vcmp.eq.f32.partialorder %v214_v8, inf  ;;  %v225_v16 = vand.u32 2147483648, %v214_v8  ;;  %vm224_vm2 = vcmp.eq.f32.partialorder %v214_v8, 0.0 }
 0x126   : > { %v424_v9 = vpop.eup %423 }
 0x127   : > { %v216_v10 = vmul.f32 %v424_v9, %v214_v8 }
 0x129   : > { %v217_v11 = vmul.f32 %v424_v9, %v216_v10 }
 0x12b   : > { %v218_v12 = vmul.f32 0.5, %v217_v11 }
 0x12d   : > { %v219_v13 = vsub.f32 1.5, %v218_v12 }
 0x12f   : > { %v220_v14 = vmul.f32 %v424_v9, %v219_v13 }
 0x131   : > { %v221_v15 = vmul.f32 %v220_v14, %v214_v8 }
 0x133   : > { %v223_v17 = vsel %vm222_vm1, %v214_v8, %v221_v15 }
 0x134   : > { %v226_v18 = vsel %vm224_vm2, %v225_v16, %v223_v17 }
 0x135   : > { %v227_v19 = vadd.f32 1e-05, %v226_v18 }
 0x137   : > { %425 = vrcp.f32 %v227_v19  ;;  %v239_v23 = vand.u32 2147483648, %v227_v19  ;;  %v237_v25 = vand.u32 2147483647, %v227_v19  ;;  %vm233_vm4 = vweird.f32 %v227_v19 }
 0x139   : > { %v240_v27 = vor.u32 1.1754944e-38, %v239_v23  ;;  %vm238_vm6 = vcmp.eq.f32.partialorder %v237_v25, 8.507059e+37 }
 0x13d   : > { %v426_v20 = vpop.eup %425 }
 0x13e   : > { %v229_v21 = vmul.f32 %v426_v20, %v227_v19  ;;  %vm234_vm3 = vweird.f32 %v426_v20 }
 0x13f   : > { %vm235_vm5 = vmor %vm233_vm4, %vm234_vm3 }
 0x140   : > { %v230_v22 = vsub.f32 1.0, %v229_v21 }
 0x142   : > { %v231_v24 = vmul.f32 %v426_v20, %v230_v22 }
 0x144   : > { %v232_v26 = vadd.f32 %v426_v20, %v231_v24 }
 0x146   : > { %v236_v28 = vsel %vm235_vm5, %v426_v20, %v232_v26 }
 0x147   : > { %v241_v30 = vsel %vm238_vm6, %v240_v27, %v236_v28 }
 0x148   : > { %v242_v31 = vmul.f32 %v241_v30, %v209_v4 }
 0x14a   : > { %v248_v33 = vmul.f32 %v421_v29, %v242_v31 }
 0x14c   : > { %v252_v34 = vadd.f32 %v422_v32, %v248_v33 }
 0x14e   : > { %253 = vst.msk [vmem:[%s202_s16] sm:$0xff] %vm204_vm0, %v252_v34 }
 0x14f   : > { %514 = shalt.err (!%p511_p11)
}
 0x150   : > { %370 = dma.vmem_to_hbm [thread:$0]  (%p646_p3), %s268_s21, 128, %s270_s22, %s255_s24  }
 0x151 PF: > { %s281_s4 = sand.u32 1, %s545_s12   ;;  %p737_p12 = scmp.ge.s32.totalorder %s557_s15, 2 }
 0x152   : > { %s282_s9 = scalar_lea.sflag [#allocation4], %s281_s4 }
 0x153   : > { %p381_p13 = pnand %p737_p12, %p615_p6 }
 0x155   : > { %p382_p0 = pneg %p381_p13 }
 0x157   : > { %540 = dma.done.wait (%p382_p0), %s282_s9, 128  }
 0x158   : > { %542 = vsyncadd (%p382_p0), %s282_s9, 4294967168  ;;  %p17_p5 = scmp.ge.s32.totalorder %s633_s26, 4   ;;  %s738_s12 = smov %s549_s13 }
 0x159   : > { %s739_s13 = smov %s553_s14  ;;  %s740_s14 = smov %s642_s29 }
 0x15a   : > { %s741_s15 = smov %s633_s26  ;;  %19 = sbr.rel (!%p17_p5) target bundleno = 6 (0x6), region = 81 }
 0x15f   :  { %288 = vsyncpa [#allocation3], 1 }
 0x160   :  { %290 = vsyncpa [#allocation3 + $0x1], 1 }
 0x161   :  { %291 = vsyncpa [#allocation6], 1 }
 0x162   :  { %292 = vsyncpa [#allocation4], 1 }
 0x163   :  { %294 = vsyncpa [#allocation4 + $0x1], 1 }

</bundles_post_ra>
